<compile_context>
chip_gen: v5e
topology: v5e:2x2
jax: 0.10.0
libtpu: 0.0.40
codegen_flags: <defaults>
</compile_context>

<pallas_src>
import jax
import jax.numpy as jnp
from jax.experimental import pallas as pl
from jax.experimental.pallas import tpu as pltpu


# ---------------------------------------------------------------------------
# Bilinear weights (PyTorch align_corners=False / half-pixel-center semantics)
# ---------------------------------------------------------------------------
def bilinear_matrix(in_size: int, out_size: int) -> jnp.ndarray:
    """1-D bilinear interpolation matrix, PyTorch align_corners=False."""
    dst = jnp.arange(out_size, dtype=jnp.float32)
    scale = in_size / out_size
    src = (dst + 0.5) * scale - 0.5
    src = jnp.maximum(src, 0.0)                    # PyTorch clamps negative src
    i0 = jnp.floor(src).astype(jnp.int32)
    i0 = jnp.minimum(i0, in_size - 1)
    i1 = jnp.minimum(i0 + 1, in_size - 1)
    w1 = src - i0.astype(jnp.float32)
    w0 = 1.0 - w1
    rows = jnp.arange(out_size)
    m = jnp.zeros((out_size, in_size), dtype=jnp.float32)
    m = m.at[rows, i0].add(w0)
    m = m.at[rows, i1].add(w1)
    return m


# ---------------------------------------------------------------------------
# Kernels
# ---------------------------------------------------------------------------
def _fused_kernel(x_ref, wk_ref, o_ref):
    # x_ref : (1, BC, H*W)      lane-dense input slab
    # wk_ref: (H*W, Ho*Wo)      kron(Wh, Ww)^T, grid-invariant
    # o_ref : (1, BC, Ho*Wo)    lane-dense output slab (unmasked stores)
    o_ref[0] = jnp.dot(
        x_ref[0], wk_ref[...], preferred_element_type=jnp.float32
    ).astype(o_ref.dtype)


def _separable_kernel(x_ref, wht_ref, wwt_ref, o_ref):
    # x_ref  : (1, BC, H, W)
    # wht_ref: (H, Ho)   (Wh already transposed in the wrapper)
    # wwt_ref: (W, Wo)   (Ww already transposed in the wrapper)
    # o_ref  : (1, BC, Ho, Wo)
    _, bc, h, w = x_ref.shape
    ho = wht_ref.shape[1]
    wo = wwt_ref.shape[1]

    x = x_ref[0]                                                   # (BC, H, W)
    # H interpolation as ONE big matmul: (BC*W, H) @ (H, Ho)
    xt = jnp.transpose(x, (0, 2, 1)).reshape(bc * w, h)
    t = jnp.dot(xt, wht_ref[...], preferred_element_type=jnp.float32)   # (BC*W, Ho)
    # W interpolation as ONE big matmul: (BC*Ho, W) @ (W, Wo)
    t = jnp.transpose(t.reshape(bc, w, ho), (0, 2, 1)).reshape(bc * ho, w)
    o = jnp.dot(t, wwt_ref[...], preferred_element_type=jnp.float32)    # (BC*Ho, Wo)
    o_ref[0] = o.reshape(bc, ho, wo).astype(o_ref.dtype)


# ---------------------------------------------------------------------------
# Wrapper
# ---------------------------------------------------------------------------
_VMEM_BUDGET = 40 * 1024 * 1024        # working-set target for block sizing
_VMEM_LIMIT = 48 * 1024 * 1024         # compiler limit (< v7x's 64 MiB VMEM)
_FUSED_WEIGHT_LIMIT = 4 * 1024 * 1024  # use single-matmul path below this


def _pick_block_channels(nc: int, per_chan_bytes: int, fixed_bytes: int,
                         target: int = 128) -> int:
    """Largest divisor of nc (<= target) whose working set fits the VMEM
    budget, preferring >= 2 grid steps so v7x's two TensorCores both get work."""
    best = 1
    for d in range(1, nc + 1):
        if nc % d or d > target:
            continue
        if nc >= 2 and nc // d < 2:        # keep at least 2 parallel grid steps
            continue
        if fixed_bytes + d * per_chan_bytes > _VMEM_BUDGET:
            continue
        best = d
    return best


def _upsample_fused(x, wh, ww):
    N, C, H, W = x.shape
    Ho, Wo = wh.shape[0], ww.shape[0]
    nc, hw, howo = N * C, H * W, Ho * Wo

    # Fold the separable weights into one (H*W, Ho*Wo) matrix:
    #   kron(Wh, Ww)[ho*Wo+wo, h*W+w] = Wh[ho,h] * Ww[wo,w]
    wk = jnp.kron(wh, ww).T.astype(jnp.float32)               # (H*W, Ho*Wo)

    per_chan = 4 * (2 * hw + 2 * howo)                        # dbl-buffered in/out
    fixed = 4 * 2 * hw * howo                                 # resident weight
    bc = _pick_block_channels(nc, per_chan, fixed)
    nblk = nc // bc

    x_blk = x.reshape(nblk, bc, hw)                           # free reshape

    out = pl.pallas_call(
        _fused_kernel,
        out_shape=jax.ShapeDtypeStruct((nblk, bc, howo), x.dtype),
        grid_spec=pltpu.PrefetchScalarGridSpec(
            num_scalar_prefetch=0,
            grid=(nblk,),
            in_specs=[
                pl.BlockSpec((1, bc, hw), lambda i: (i, 0, 0)),
                pl.BlockSpec((hw, howo), lambda i: (0, 0)),
            ],
            out_specs=pl.BlockSpec((1, bc, howo), lambda i: (i, 0, 0)),
        ),
        compiler_params=pltpu.CompilerParams(
            dimension_semantics=("parallel",),
            vmem_limit_bytes=_VMEM_LIMIT,
        ),
    )(x_blk, wk)

    return out.reshape(N, C, Ho, Wo)


def _upsample_separable(x, wh, ww):
    N, C, H, W = x.shape
    Ho, Wo = wh.shape[0], ww.shape[0]
    nc = N * C

    wht = wh.T.astype(jnp.float32)                            # (H, Ho)
    wwt = ww.T.astype(jnp.float32)                            # (W, Wo)

    per_chan = 4 * (2 * H * W + 2 * Ho * Wo + 2 * W * Ho)     # in/out + intermediates
    fixed = 4 * 2 * (H * Ho + W * Wo)
    bc = _pick_block_channels(nc, per_chan, fixed)
    nblk = nc // bc

    x_blk = x.reshape(nblk, bc, H, W)

    out = pl.pallas_call(
        _separable_kernel,
        out_shape=jax.ShapeDtypeStruct((nblk, bc, Ho, Wo), x.dtype),
        grid_spec=pltpu.PrefetchScalarGridSpec(
            num_scalar_prefetch=0,
            grid=(nblk,),
            in_specs=[
                pl.BlockSpec((1, bc, H, W), lambda i: (i, 0, 0, 0)),
                pl.BlockSpec((H, Ho), lambda i: (0, 0)),
                pl.BlockSpec((W, Wo), lambda i: (0, 0)),
            ],
            out_specs=pl.BlockSpec((1, bc, Ho, Wo), lambda i: (i, 0, 0, 0)),
        ),
        compiler_params=pltpu.CompilerParams(
            dimension_semantics=("parallel",),
            vmem_limit_bytes=_VMEM_LIMIT,
        ),
    )(x_blk, wht, wwt)

    return out.reshape(N, C, Ho, Wo)


def upsample_bilinear(x: jnp.ndarray, factor: int = 2) -> jnp.ndarray:
    """x: (N, C, H, W) float32 -> (N, C, H*factor, W*factor), PyTorch
    Upsample(mode='bilinear', align_corners=False) semantics."""
    N, C, H, W = x.shape
    Ho, Wo = H * factor, W * factor
    wh = bilinear_matrix(H, Ho)                               # (Ho, H)
    ww = bilinear_matrix(W, Wo)                               # (Wo, W)

    if 4 * H * W * Ho * Wo <= _FUSED_WEIGHT_LIMIT:
        return _upsample_fused(x, wh, ww)
    return _upsample_separable(x, wh, ww)


if __name__ == "__main__":
    key = jax.random.PRNGKey(0)
    N, C, H, W = 2, 4, 16, 16
    x = jax.random.normal(key, (N, C, H, W), dtype=jnp.float32)

    out = upsample_bilinear(x, factor=2)
    out = jax.block_until_ready(out)

    assert out.shape == (N, C, 2 * H, 2 * W), out.shape

    # Cross-check against jax.image.resize (same half-pixel-center bilinear).
    ref = jax.image.resize(x, (N, C, 2 * H, 2 * W), method="bilinear")
    err = float(jnp.max(jnp.abs(out - ref)))
    assert err < 1e-4, err

    print("KERNEL_OK")
</pallas_src>

<mosaic_0001>
module attributes {stable_mosaic.version = 11 : i64} {
  func.func @_fused_kernel(%arg0: i32, %arg1: memref<1x4x256xf32, #tpu.memory_space<vmem>>, %arg2: memref<256x1024xf32, #tpu.memory_space<vmem>>, %arg3: memref<1x4x1024xf32, #tpu.memory_space<vmem>>) attributes {dimension_semantics = [#tpu.dimension_semantics<parallel>], iteration_bounds = array<i64: 2>, scalar_prefetch = 0 : i64, scratch_operands = 0 : i64, tpu.core_type = #tpu.core_type<tc>, window_params = [{transform_indices = @transform_0, window_bounds = array<i64: 1, 4, 256>}, {pipeline_mode = #tpu.pipeline_mode<synchronous>, transform_indices = @transform_1, window_bounds = array<i64: 256, 1024>}, {transform_indices = @transform_2, window_bounds = array<i64: 1, 4, 1024>}]} {
    %c0 = arith.constant 0 : index
    %c0_0 = arith.constant 0 : index
    %c0_1 = arith.constant 0 : index
    %0 = vector.load %arg1[%c0, %c0_0, %c0_1] : memref<1x4x256xf32, #tpu.memory_space<vmem>>, vector<1x4x256xf32>
    %1 = vector.shape_cast %0 : vector<1x4x256xf32> to vector<4x256xf32>
    %c0_2 = arith.constant 0 : index
    %c0_3 = arith.constant 0 : index
    %2 = vector.load %arg2[%c0_2, %c0_3] : memref<256x1024xf32, #tpu.memory_space<vmem>>, vector<256x1024xf32>
    %cst = arith.constant dense<0.000000e+00> : vector<4x1024xf32>
    %3 = tpu.matmul %1, %2, %cst {dimension_numbers = #tpu.dot_dimension_numbers<[1], [0], [0], [1], [0, 0, 1, 1], [], []>} : vector<4x256xf32>, vector<256x1024xf32>, vector<4x1024xf32> -> vector<4x1024xf32>
    %c0_4 = arith.constant 0 : index
    %c0_5 = arith.constant 0 : index
    %c0_6 = arith.constant 0 : index
    %4 = vector.load %arg3[%c0_4, %c0_5, %c0_6] : memref<1x4x1024xf32, #tpu.memory_space<vmem>>, vector<1x4x1024xf32>
    %5 = vector.shape_cast %4 : vector<1x4x1024xf32> to vector<4x1024xf32>
    %6 = vector.shape_cast %3 : vector<4x1024xf32> to vector<1x4x1024xf32>
    tpu.vector_store %arg3[%c0_4, %c0_5, %c0_6], %6 {strides = array<i32>} : memref<1x4x1024xf32, #tpu.memory_space<vmem>>, vector<1x4x1024xf32>,
    return
  }
  func.func @transform_0(%arg0: i32) -> (i32, i32, i32) {
    %c0_i32 = arith.constant 0 : i32
    %c0_i32_0 = arith.constant 0 : i32
    %c0_i32_1 = arith.constant 0 : i32
    return %arg0, %c0_i32, %c0_i32_0 : i32, i32, i32
  }
  func.func @transform_1(%arg0: i32) -> (i32, i32) {
    %c0_i32 = arith.constant 0 : i32
    %c0_i32_0 = arith.constant 0 : i32
    %c0_i32_1 = arith.constant 0 : i32
    return %c0_i32, %c0_i32_0 : i32, i32
  }
  func.func @transform_2(%arg0: i32) -> (i32, i32, i32) {
    %c0_i32 = arith.constant 0 : i32
    %c0_i32_0 = arith.constant 0 : i32
    %c0_i32_1 = arith.constant 0 : i32
    return %arg0, %c0_i32, %c0_i32_0 : i32, i32, i32
  }
}

</mosaic_0001>

<bundles_post_ra>
// kernel: tpu_custom_call.1
= control target key start
LH: loop header
LB: loop body
LE: loop exit
PB: predicated region body
PF: predicated region fallthrough
CT: control target
= control target key end

     0   :  { %7 = vsyncpa [#allocation3], 0  ;;  %s1282_s0 = inlined_call_operand.hbm [shape: f32[2,4,256], index: 0, kind: input, shape index: {}]   ;;  %s1283_s1 = inlined_call_operand.hbm [shape: f32[256,1024], index: 1, kind: input, shape index: {}]   ;;  %s1284_s2 = inlined_call_operand.hbm [shape: f32[2,4,1024], index: 2, kind: output, shape index: {}]  }
   0x1   :  { %9 = vsyncpa [#allocation3 + $0x1], 0 }
   0x2   :  { %10 = vsyncpa [#allocation6], 0 }
   0x3   :  { %11 = vsyncpa [#allocation4], 0 }
   0x4   :  { %13 = vsyncpa [#allocation4 + $0x1], 0  ;;  %s1111_s9 = smov 0   ;;  %s1113_s10 = smov 0  }
   0x5   :  { %s1115_s11 = smov 0   ;;  %s1117_s12 = smov 0  }
   0x6 LB: > { %s108_s15 = sshll.u32 %s1283_s1, 4  ;;  %s1135_s16 = sadd.s32 4294967295, %s1091_s12   ;;  %s1091_s12 = sphi %s1117_s12, %s1294_s12   ;;  %s1087_s11 = sphi %s1115_s11, %s1293_s11   ;;  %s1083_s10 = sphi %s1113_s10, %s1292_s10   ;;  %s1079_s9 = sphi %s1111_s9, %s1291_s9   ;;  %s109_s15 = int_to_ptr.hbm [resolvable:$true] %s108_s15 }
   0x7   : > { %p885_p0 = scmp.ge.s32.totalorder %s1091_s12, 1  ;;  %p40_p1 = scmp.eq.s32.totalorder %s1135_s16, 0 }
   0x8   : > { %p97_p2 = scmp.lt.s32.totalorder %s1091_s12, 3  ;;  %s1093_s18 = smov [#allocation5]  }
   0x9   : > { %s110_s19 = sshll.u32 %s1093_s18, 4  ;;  %s1094_s20 = smov 1024   ;;  %s111_s19 = int_to_ptr.vmem [resolvable:$true] %s110_s19 }
   0xa   : > { %p1140_p3 = pnand %p885_p0, %p97_p2  ;;  %s1095_s21 = smov 64  }
   0xb   : > { %s884_s22 = sadd.s32 4294967294, %s1091_s12   ;;  %s1151_s23 = sadd.s32 1, %s1091_s12  }
   0xc   : > { %p910_p4 = pneg %p1140_p3  ;;  %s26_s24 = sadd.s32 1, %s1087_s11 }
   0xd   : > { %s23_s25 = ssub.s32 %s1091_s12, %s1151_s23  ;;  %p33_p7 = scmp.ne.s32.totalorder %s1087_s11, %s1083_s10 }
   0xe   : > { %p911_p6 = pnand %p910_p4, %p40_p1  ;;  %p24_p8 = scmp.eq.s32.totalorder %s23_s25, 0 }
   0xf   : > { %p34_p9 = scmp.eq.s32.totalorder %s1091_s12, 0  ;;  %p39_p10 = scmp.ne.s32.totalorder %s1083_s10, %s1079_s9 }
  0x10   : > { %913 = dma.hbm_to_vmem [thread:$0]  (!%p911_p6), %s109_s15, 32768, %s111_s19, [#allocation6], %s1094_s20, %s1094_s20, %s1095_s21  }
  0x11   : > { %p84_p11 = scmp.eq.s32.totalorder %s1135_s16, 1  ;;  %p1167_p12 = por %p40_p1, %p39_p10 }
  0x12   : > { %s1163_s26 = scalar_select %p24_p8, %s1087_s11, %s26_s24  }
  0x13   : > { %p1171_p13 = por %p84_p11, %p33_p7  ;;  %p90_p0 = scmp.eq.s32.totalorder %s884_s22, 1 }
  0x14   : > { %p35_p2 = por %p34_p9, %p33_p7  ;;  %s124_s29 = sand.u32 1, %s1087_s11  }
  0x15   : > { %p1176_p4 = por %p90_p0, %p39_p10  ;;  %p923_p6 = scmp.lt.s32.totalorder %s1091_s12, 2 }
  0x16   : > { %s888_s3 = sshll.u32 %s124_s29, 3  ;;  %s900_s4 = sshll.u32 %s1091_s12, 3 }
  0x17   : > { %s133_s7 = scalar_lea.hbm %s1282_s0, %s900_s4  ;;  %s128_s13 = scalar_lea.vmem [#allocation2], %s888_s3 }
  0x18   : > { %s135_s8 = sshll.u32 %s133_s7, 4  ;;  %s137_s14 = sshll.u32 %s128_s13, 4  ;;  %s136_s8 = int_to_ptr.hbm [resolvable:$true] %s135_s8  ;;  %s138_s14 = int_to_ptr.vmem [resolvable:$true] %s137_s14 }
  0x19   : > { %p1185_p8 = pnand %p923_p6, %p35_p2  ;;  %s125_s18 = scalar_lea.sflag [#allocation3], %s124_s29 }
  0x1a   : > { %s991_s19 = sshra.s32 %s136_s8, 4  ;;  %s998_s24 = scalar_lea.hbm %s1282_s0, 16  ;;  %s992_s19 = int_to_ptr.hbm [resolvable:$true] %s991_s19 }
  0x1b   : > { %s993_s20 = scalar_lea.hbm %s992_s19, 8  ;;  %p995_p9 = pneg %p1185_p8 }
  0x1c   : > { %p994_p7 = scmp.ne.s32.totalorder %s992_s19, %s993_s20  ;;  %p999_p0 = scmp.lt.s32.totalorder %s992_s19, %s1282_s0 }
  0x1d   : > { %p1000_p2 = scmp.lt.s32.totalorder %s998_s24, %s993_s20 }
  0x1e   : > { %p996_p10 = pnand %p995_p9, %p994_p7 }
  0x1f   : > { %p1001_p6 = por %p1000_p2, %p999_p0 }
  0x20   : > { %p997_p11 = pneg %p996_p10 }
  0x22   : > { %p1002_p5 = pnand %p1001_p6, %p997_p11 }
  0x24   : > { %1005 = shalt.err (!%p1002_p5)
}
  0x25   : > { %917 = dma.hbm_to_vmem [thread:$0]  (!%p1185_p8), %s136_s8, 128, %s138_s14, %s125_s18  }
  0x26   : > { %146 = sbr.rel (%p1140_p3) target bundleno = 317 (0x13d), region = 28  ;;  %s1202_s29 = sand.u32 (!%p1140_p3), 1, %s1083_s10  }
  0x27   : > { %s892_s4 = sshll.u32 (!%p1140_p3), %s1202_s29, 3  ;;  %s149_s5 = scalar_lea.sflag (!%p1140_p3), [#allocation3], %s1202_s29 }
  0x28   : > { %s1206_s6 = scalar_lea.vmem (!%p1140_p3), [#allocation2], %s892_s4 }
  0x2b   : > { %1066 = dma.done.wait (%p1167_p12), %s149_s5, 128  }
  0x2c   : > { %1068 = vsyncadd (%p1167_p12), %s149_s5, 4294967168 }
  0x2d   : > { %1070 = dma.done.wait (%p40_p1), [#allocation6], 32768  }
  0x2e   : > { %1072 = vsyncadd (%p40_p1), [#allocation6], 4294934528  ;;  %v301_v0 = vld [vmem:[#allocation5 + $0x3c8] sm:$0xff]  ;;  %v300_v6 = vld [vmem:[#allocation5 + $0x3c0] sm:$0xff]  ;;  %s894_s17 = sshll.u32 %s1202_s29, 5  ;;  %vm774_vm0 = vcmask 1043456  }
  0x2f   : > { %v429_v1 = vld [vmem:[#allocation5 + $0x7c8] sm:$0xff]  ;;  %482 = vmatpush.msra.mxu2 %v301_v0  ;;  %v428_v8 = vld [vmem:[#allocation5 + $0x7c0] sm:$0xff]  ;;  %442 = vmatpush.msra.mxu0 %v300_v6  ;;  %v303_v60 = vld [vmem:[#allocation5 + $0x3d8] sm:$0xff]  ;;  %s1239_s27 = scalar_lea.vmem [#allocation7], %s894_s17  ;;  %s901_s7 = sshll.u32 %s1135_s16, 5 }
  0x30   : > { %v293_v2 = vld [vmem:[#allocation5 + $0x388] sm:$0xff]  ;;  %502 = vmatpush.msra.mxu3 %v429_v1  ;;  %462 = vmatpush.msra.mxu1 %v428_v8  ;;  %v292_v10 = vld [vmem:[#allocation5 + $0x380] sm:$0xff]  ;;  %v431_v61 = vld [vmem:[#allocation5 + $0x7d8] sm:$0xff]  ;;  %s799_s14 = scalar_lea.hbm %s1284_s2, %s901_s7  ;;  %s801_s15 = sshll.u32 %s1239_s27, 4  ;;  %s802_s15 = int_to_ptr.vmem [resolvable:$true] %s801_s15 }
  0x31   : > { %v421_v3 = vld [vmem:[#allocation5 + $0x788] sm:$0xff]  ;;  %483 = vmatpush.msra.mxu2 %v293_v2  ;;  %v420_v11 = vld [vmem:[#allocation5 + $0x780] sm:$0xff]  ;;  %443 = vmatpush.msra.mxu0 %v292_v10  ;;  %v295_v0 = vld [vmem:[#allocation5 + $0x398] sm:$0xff]  ;;  %s803_s18 = sshll.u32 %s799_s14, 4  ;;  %s788_s16 = scalar_lea.sflag [#allocation4], %s1202_s29  ;;  %s804_s18 = int_to_ptr.hbm [resolvable:$true] %s803_s18 }
  0x32   : > { %v285_v4 = vld [vmem:[#allocation5 + $0x348] sm:$0xff]  ;;  %503 = vmatpush.msra.mxu3 %v421_v3  ;;  %v284_v12 = vld [vmem:[#allocation5 + $0x340] sm:$0xff]  ;;  %463 = vmatpush.msra.mxu1 %v420_v11  ;;  %v423_v1 = vld [vmem:[#allocation5 + $0x798] sm:$0xff]  ;;  %s1035_s19 = sshra.s32 %s804_s18, 4  ;;  %s1041_s24 = scalar_lea.hbm %s1284_s2, 64  ;;  %s1036_s19 = int_to_ptr.hbm [resolvable:$true] %s1035_s19 }
  0x33   : > { %v413_v5 = vld [vmem:[#allocation5 + $0x748] sm:$0xff]  ;;  %484 = vmatpush.msra.mxu2 %v285_v4  ;;  %v412_v13 = vld [vmem:[#allocation5 + $0x740] sm:$0xff]  ;;  %444 = vmatpush.msra.mxu0 %v284_v12  ;;  %v287_v4 = vld [vmem:[#allocation5 + $0x358] sm:$0xff]  ;;  %s1037_s20 = scalar_lea.hbm %s1036_s19, 32  ;;  %p1042_p12 = scmp.lt.s32.totalorder %s1036_s19, %s1284_s2 }
  0x34   : > { %v277_v7 = vld [vmem:[#allocation5 + $0x308] sm:$0xff]  ;;  %504 = vmatpush.msra.mxu3 %v413_v5  ;;  %v276_v16 = vld [vmem:[#allocation5 + $0x300] sm:$0xff]  ;;  %464 = vmatpush.msra.mxu1 %v412_v13  ;;  %v415_v5 = vld [vmem:[#allocation5 + $0x758] sm:$0xff]  ;;  %p1038_p1 = scmp.ne.s32.totalorder %s1036_s19, %s1037_s20  ;;  %p1043_p8 = scmp.lt.s32.totalorder %s1041_s24, %s1037_s20 }
  0x35   : > { %v405_v9 = vld [vmem:[#allocation5 + $0x708] sm:$0xff]  ;;  %485 = vmatpush.msra.mxu2 %v277_v7  ;;  %v404_v17 = vld [vmem:[#allocation5 + $0x700] sm:$0xff]  ;;  %445 = vmatpush.msra.mxu0 %v276_v16  ;;  %v302_v6 = vld [vmem:[#allocation5 + $0x3d0] sm:$0xff] }
  0x36   : > { %v269_v14 = vld [vmem:[#allocation5 + $0x2c8] sm:$0xff]  ;;  %505 = vmatpush.msra.mxu3 %v405_v9  ;;  %v268_v20 = vld [vmem:[#allocation5 + $0x2c0] sm:$0xff]  ;;  %465 = vmatpush.msra.mxu1 %v404_v17  ;;  %v430_v7 = vld [vmem:[#allocation5 + $0x7d0] sm:$0xff]  ;;  %p1039_p3 = pnand %p1038_p1, %p1171_p13  ;;  %p1044_p7 = por %p1043_p8, %p1042_p12 }
  0x37   : > { %v397_v15 = vld [vmem:[#allocation5 + $0x6c8] sm:$0xff]  ;;  %486 = vmatpush.msra.mxu2 %v269_v14  ;;  %v396_v21 = vld [vmem:[#allocation5 + $0x6c0] sm:$0xff]  ;;  %446 = vmatpush.msra.mxu0 %v268_v20  ;;  %v279_v8 = vld [vmem:[#allocation5 + $0x318] sm:$0xff] }
  0x38   : > { %v261_v18 = vld [vmem:[#allocation5 + $0x288] sm:$0xff]  ;;  %506 = vmatpush.msra.mxu3 %v397_v15  ;;  %v260_v24 = vld [vmem:[#allocation5 + $0x280] sm:$0xff]  ;;  %466 = vmatpush.msra.mxu1 %v396_v21  ;;  %v407_v9 = vld [vmem:[#allocation5 + $0x718] sm:$0xff]  ;;  %p1040_p5 = pneg %p1039_p3 }
  0x39   : > { %v389_v19 = vld [vmem:[#allocation5 + $0x688] sm:$0xff]  ;;  %487 = vmatpush.msra.mxu2 %v261_v18  ;;  %v388_v25 = vld [vmem:[#allocation5 + $0x680] sm:$0xff]  ;;  %447 = vmatpush.msra.mxu0 %v260_v24  ;;  %v294_v10 = vld [vmem:[#allocation5 + $0x390] sm:$0xff] }
  0x3a   : > { %v253_v22 = vld [vmem:[#allocation5 + $0x248] sm:$0xff]  ;;  %507 = vmatpush.msra.mxu3 %v389_v19  ;;  %v252_v28 = vld [vmem:[#allocation5 + $0x240] sm:$0xff]  ;;  %467 = vmatpush.msra.mxu1 %v388_v25  ;;  %v422_v11 = vld [vmem:[#allocation5 + $0x790] sm:$0xff]  ;;  %p1045_p9 = pnand %p1044_p7, %p1040_p5 }
  0x3b   : > { %v381_v23 = vld [vmem:[#allocation5 + $0x648] sm:$0xff]  ;;  %488 = vmatpush.msra.mxu2 %v253_v22  ;;  %v380_v29 = vld [vmem:[#allocation5 + $0x640] sm:$0xff]  ;;  %448 = vmatpush.msra.mxu0 %v252_v28  ;;  %v271_v12 = vld [vmem:[#allocation5 + $0x2d8] sm:$0xff] }
  0x3c   : > { %v245_v26 = vld [vmem:[#allocation5 + $0x208] sm:$0xff]  ;;  %508 = vmatpush.msra.mxu3 %v381_v23  ;;  %v244_v32 = vld [vmem:[#allocation5 + $0x200] sm:$0xff]  ;;  %468 = vmatpush.msra.mxu1 %v380_v29  ;;  %v399_v13 = vld [vmem:[#allocation5 + $0x6d8] sm:$0xff] }
  0x3d   : > { %v373_v27 = vld [vmem:[#allocation5 + $0x608] sm:$0xff]  ;;  %489 = vmatpush.msra.mxu2 %v245_v26  ;;  %v372_v33 = vld [vmem:[#allocation5 + $0x600] sm:$0xff]  ;;  %449 = vmatpush.msra.mxu0 %v244_v32  ;;  %v286_v14 = vld [vmem:[#allocation5 + $0x350] sm:$0xff] }
  0x3e   : > { %v237_v30 = vld [vmem:[#allocation5 + $0x1c8] sm:$0xff]  ;;  %509 = vmatpush.msra.mxu3 %v373_v27  ;;  %v236_v36 = vld [vmem:[#allocation5 + $0x1c0] sm:$0xff]  ;;  %469 = vmatpush.msra.mxu1 %v372_v33  ;;  %v414_v15 = vld [vmem:[#allocation5 + $0x750] sm:$0xff] }
  0x3f   : > { %v365_v31 = vld [vmem:[#allocation5 + $0x5c8] sm:$0xff]  ;;  %490 = vmatpush.msra.mxu2 %v237_v30  ;;  %v364_v37 = vld [vmem:[#allocation5 + $0x5c0] sm:$0xff]  ;;  %450 = vmatpush.msra.mxu0 %v236_v36  ;;  %v263_v16 = vld [vmem:[#allocation5 + $0x298] sm:$0xff] }
  0x40   : > { %v229_v34 = vld [vmem:[#allocation5 + $0x188] sm:$0xff]  ;;  %510 = vmatpush.msra.mxu3 %v365_v31  ;;  %v228_v40 = vld [vmem:[#allocation5 + $0x180] sm:$0xff]  ;;  %470 = vmatpush.msra.mxu1 %v364_v37  ;;  %v391_v17 = vld [vmem:[#allocation5 + $0x698] sm:$0xff] }
  0x41   : > { %v357_v35 = vld [vmem:[#allocation5 + $0x588] sm:$0xff]  ;;  %491 = vmatpush.msra.mxu2 %v229_v34  ;;  %v356_v41 = vld [vmem:[#allocation5 + $0x580] sm:$0xff]  ;;  %451 = vmatpush.msra.mxu0 %v228_v40  ;;  %v278_v18 = vld [vmem:[#allocation5 + $0x310] sm:$0xff] }
  0x42   : > { %v221_v38 = vld [vmem:[#allocation5 + $0x148] sm:$0xff]  ;;  %511 = vmatpush.msra.mxu3 %v357_v35  ;;  %v220_v44 = vld [vmem:[#allocation5 + $0x140] sm:$0xff]  ;;  %471 = vmatpush.msra.mxu1 %v356_v41  ;;  %v406_v19 = vld [vmem:[#allocation5 + $0x710] sm:$0xff] }
  0x43   : > { %v349_v39 = vld [vmem:[#allocation5 + $0x548] sm:$0xff]  ;;  %492 = vmatpush.msra.mxu2 %v221_v38  ;;  %v348_v45 = vld [vmem:[#allocation5 + $0x540] sm:$0xff]  ;;  %452 = vmatpush.msra.mxu0 %v220_v44  ;;  %v179_v20 = vld [vmem:[%s1206_s6] sm:$0xff] }
  0x44   : > { %v213_v42 = vld [vmem:[#allocation5 + $0x108] sm:$0xff]  ;;  %512 = vmatpush.msra.mxu3 %v349_v39  ;;  %v212_v48 = vld [vmem:[#allocation5 + $0x100] sm:$0xff]  ;;  %472 = vmatpush.msra.mxu1 %v348_v45  ;;  %v255_v21 = vld [vmem:[#allocation5 + $0x258] sm:$0xff]  ;;  %437 = vst [vmem:[#allocation1] ss:$2 sm:$0xff] %v179_v20 }
  0x45   : > { %v341_v43 = vld [vmem:[#allocation5 + $0x508] sm:$0xff]  ;;  %493 = vmatpush.msra.mxu2 %v213_v42  ;;  %v340_v49 = vld [vmem:[#allocation5 + $0x500] sm:$0xff]  ;;  %453 = vmatpush.msra.mxu0 %v212_v48  ;;  %v383_v22 = vld [vmem:[#allocation5 + $0x658] sm:$0xff] }
  0x46   : > { %v205_v46 = vld [vmem:[#allocation5 + $0xc8] sm:$0xff]  ;;  %513 = vmatpush.msra.mxu3 %v341_v43  ;;  %v204_v52 = vld [vmem:[#allocation5 + $0xc0] sm:$0xff]  ;;  %473 = vmatpush.msra.mxu1 %v340_v49  ;;  %v270_v23 = vld [vmem:[#allocation5 + $0x2d0] sm:$0xff] }
  0x47   : > { %v333_v47 = vld [vmem:[#allocation5 + $0x4c8] sm:$0xff]  ;;  %494 = vmatpush.msra.mxu2 %v205_v46  ;;  %v332_v53 = vld [vmem:[#allocation5 + $0x4c0] sm:$0xff]  ;;  %454 = vmatpush.msra.mxu0 %v204_v52  ;;  %v398_v24 = vld [vmem:[#allocation5 + $0x6d0] sm:$0xff] }
  0x48   : > { %v197_v50 = vld [vmem:[#allocation5 + $0x88] sm:$0xff]  ;;  %514 = vmatpush.msra.mxu3 %v333_v47  ;;  %v196_v56 = vld [vmem:[#allocation5 + $0x80] sm:$0xff]  ;;  %474 = vmatpush.msra.mxu1 %v332_v53  ;;  %v247_v25 = vld [vmem:[#allocation5 + $0x218] sm:$0xff] }
  0x49   : > { %v325_v51 = vld [vmem:[#allocation5 + $0x488] sm:$0xff]  ;;  %495 = vmatpush.msra.mxu2 %v197_v50  ;;  %v324_v57 = vld [vmem:[#allocation5 + $0x480] sm:$0xff]  ;;  %455 = vmatpush.msra.mxu0 %v196_v56  ;;  %v375_v26 = vld [vmem:[#allocation5 + $0x618] sm:$0xff] }
  0x4a   : > { %v189_v54 = vld [vmem:[#allocation5 + $0x48] sm:$0xff]  ;;  %515 = vmatpush.msra.mxu3 %v325_v51  ;;  %475 = vmatpush.msra.mxu1 %v324_v57  ;;  %v188_v62 = vld [vmem:[#allocation5 + $0x40] sm:$0xff]  ;;  %v262_v27 = vld [vmem:[#allocation5 + $0x290] sm:$0xff] }
  0x4b   : > { %v317_v55 = vld [vmem:[#allocation5 + $0x448] sm:$0xff]  ;;  %496 = vmatpush.msra.mxu2 %v189_v54  ;;  %v316_v63 = vld [vmem:[#allocation5 + $0x440] sm:$0xff]  ;;  %456 = vmatpush.msra.mxu0 %v188_v62  ;;  %v390_v28 = vld [vmem:[#allocation5 + $0x690] sm:$0xff] }
  0x4c   : > { %v181_v58 = vld [vmem:[#allocation5 + $0x8] sm:$0xff]  ;;  %516 = vmatpush.msra.mxu3 %v317_v55  ;;  %v180_v2 = vld [vmem:[#allocation5] sm:$0xff]  ;;  %476 = vmatpush.msra.mxu1 %v316_v63  ;;  %v239_v29 = vld [vmem:[#allocation5 + $0x1d8] sm:$0xff] }
  0x4d   : > { %v309_v59 = vld [vmem:[#allocation5 + $0x408] sm:$0xff]  ;;  %497 = vmatpush.msra.mxu2 %v181_v58  ;;  %v308_v3 = vld [vmem:[#allocation5 + $0x400] sm:$0xff]  ;;  %457 = vmatpush.msra.mxu0 %v180_v2  ;;  %v367_v30 = vld [vmem:[#allocation5 + $0x5d8] sm:$0xff] }
  0x4e   : > { %517 = vmatpush.msra.mxu3 %v309_v59  ;;  %477 = vmatpush.msra.mxu1 %v308_v3  ;;  %v254_v31 = vld [vmem:[#allocation5 + $0x250] sm:$0xff]  ;;  %v231_v33 = vld [vmem:[#allocation5 + $0x198] sm:$0xff]  ;;  %v1217_v55 = vld.sshfl [vmem:[#allocation1] sm:$0xff pattern:$0x75316420] }
  0x4f   : > { %562 = vmatpush.msrb.mxu2 %v303_v60  ;;  %522 = vmatpush.msrb.mxu0 %v302_v6  ;;  %v382_v32 = vld [vmem:[#allocation5 + $0x650] sm:$0xff]  ;;  %v359_v34 = vld [vmem:[#allocation5 + $0x598] sm:$0xff]  ;;  %v305_v59 = vld [vmem:[#allocation5 + $0x3e8] sm:$0xff] }
  0x50   : > { %582 = vmatpush.msrb.mxu3 %v431_v61  ;;  %542 = vmatpush.msrb.mxu1 %v430_v7  ;;  %v246_v35 = vld [vmem:[#allocation5 + $0x210] sm:$0xff]  ;;  %v223_v37 = vld [vmem:[#allocation5 + $0x158] sm:$0xff]  ;;  %v433_v60 = vld [vmem:[#allocation5 + $0x7e8] sm:$0xff] }
  0x51   : > { %563 = vmatpush.msrb.mxu2 %v295_v0  ;;  %523 = vmatpush.msrb.mxu0 %v294_v10  ;;  %v374_v36 = vld [vmem:[#allocation5 + $0x610] sm:$0xff]  ;;  %v351_v38 = vld [vmem:[#allocation5 + $0x558] sm:$0xff]  ;;  %v297_v63 = vld [vmem:[#allocation5 + $0x3a8] sm:$0xff] }
  0x52   : > { %583 = vmatpush.msrb.mxu3 %v423_v1  ;;  %543 = vmatpush.msrb.mxu1 %v422_v11  ;;  %v238_v39 = vld [vmem:[#allocation5 + $0x1d0] sm:$0xff]  ;;  %v215_v41 = vld [vmem:[#allocation5 + $0x118] sm:$0xff]  ;;  %v425_v0 = vld [vmem:[#allocation5 + $0x7a8] sm:$0xff] }
  0x53   : > { %564 = vmatpush.msrb.mxu2 %v287_v4  ;;  %524 = vmatpush.msrb.mxu0 %v286_v14  ;;  %v366_v40 = vld [vmem:[#allocation5 + $0x5d0] sm:$0xff]  ;;  %v343_v42 = vld [vmem:[#allocation5 + $0x518] sm:$0xff]  ;;  %v289_v3 = vld [vmem:[#allocation5 + $0x368] sm:$0xff] }
  0x54   : > { %584 = vmatpush.msrb.mxu3 %v415_v5  ;;  %544 = vmatpush.msrb.mxu1 %v414_v15  ;;  %v230_v43 = vld [vmem:[#allocation5 + $0x190] sm:$0xff]  ;;  %v207_v45 = vld [vmem:[#allocation5 + $0xd8] sm:$0xff]  ;;  %v417_v4 = vld [vmem:[#allocation5 + $0x768] sm:$0xff] }
  0x55   : > { %565 = vmatpush.msrb.mxu2 %v279_v8  ;;  %525 = vmatpush.msrb.mxu0 %v278_v18  ;;  %v358_v44 = vld [vmem:[#allocation5 + $0x590] sm:$0xff]  ;;  %v335_v46 = vld [vmem:[#allocation5 + $0x4d8] sm:$0xff]  ;;  %v281_v7 = vld [vmem:[#allocation5 + $0x328] sm:$0xff] }
  0x56   : > { %585 = vmatpush.msrb.mxu3 %v407_v9  ;;  %545 = vmatpush.msrb.mxu1 %v406_v19  ;;  %v222_v47 = vld [vmem:[#allocation5 + $0x150] sm:$0xff]  ;;  %v199_v49 = vld [vmem:[#allocation5 + $0x98] sm:$0xff]  ;;  %v409_v8 = vld [vmem:[#allocation5 + $0x728] sm:$0xff] }
  0x57   : > { %566 = vmatpush.msrb.mxu2 %v271_v12  ;;  %526 = vmatpush.msrb.mxu0 %v270_v23  ;;  %v350_v48 = vld [vmem:[#allocation5 + $0x550] sm:$0xff]  ;;  %v327_v50 = vld [vmem:[#allocation5 + $0x498] sm:$0xff]  ;;  %v304_v11 = vld [vmem:[#allocation5 + $0x3e0] sm:$0xff] }
  0x58   : > { %586 = vmatpush.msrb.mxu3 %v399_v13  ;;  %546 = vmatpush.msrb.mxu1 %v398_v24  ;;  %v214_v51 = vld [vmem:[#allocation5 + $0x110] sm:$0xff]  ;;  %v191_v53 = vld [vmem:[#allocation5 + $0x58] sm:$0xff]  ;;  %v432_v12 = vld [vmem:[#allocation5 + $0x7e0] sm:$0xff] }
  0x59   : > { %567 = vmatpush.msrb.mxu2 %v263_v16  ;;  %527 = vmatpush.msrb.mxu0 %v262_v27  ;;  %v342_v52 = vld [vmem:[#allocation5 + $0x510] sm:$0xff]  ;;  %v319_v54 = vld [vmem:[#allocation5 + $0x458] sm:$0xff]  ;;  %v273_v13 = vld [vmem:[#allocation5 + $0x2e8] sm:$0xff] }
  0x5a   : > { %587 = vmatpush.msrb.mxu3 %v391_v17  ;;  %547 = vmatpush.msrb.mxu1 %v390_v28  ;;  %v1219_v56 = vld.sshfl [vmem:[#allocation1 + $0x8] sm:$0xff pattern:$0x75316420]  ;;  %v183_v57 = vld [vmem:[#allocation5 + $0x18] sm:$0xff]  ;;  %v401_v14 = vld [vmem:[#allocation5 + $0x6e8] sm:$0xff] }
  0x5b   : > { %568 = vmatpush.msrb.mxu2 %v255_v21  ;;  %528 = vmatpush.msrb.mxu0 %v254_v31  ;;  %v311_v58 = vld [vmem:[#allocation5 + $0x418] sm:$0xff]  ;;  %v206_v61 = vld [vmem:[#allocation5 + $0xd0] sm:$0xff]  ;;  %v296_v15 = vld [vmem:[#allocation5 + $0x3a0] sm:$0xff] }
  0x5c   : > { %588 = vmatpush.msrb.mxu3 %v383_v22  ;;  %548 = vmatpush.msrb.mxu1 %v382_v32  ;;  %v334_v62 = vld [vmem:[#allocation5 + $0x4d0] sm:$0xff]  ;;  %v424_v16 = vld [vmem:[#allocation5 + $0x7a0] sm:$0xff]  ;;  %v265_v17 = vld [vmem:[#allocation5 + $0x2a8] sm:$0xff] }
  0x5d   : > { %569 = vmatpush.msrb.mxu2 %v247_v25  ;;  %529 = vmatpush.msrb.mxu0 %v246_v35  ;;  %v198_v1 = vld [vmem:[#allocation5 + $0x90] sm:$0xff]  ;;  %v393_v18 = vld [vmem:[#allocation5 + $0x6a8] sm:$0xff]  ;;  %v288_v19 = vld [vmem:[#allocation5 + $0x360] sm:$0xff] }
  0x5e   : > { %589 = vmatpush.msrb.mxu3 %v375_v26  ;;  %549 = vmatpush.msrb.mxu1 %v374_v36  ;;  %v326_v2 = vld [vmem:[#allocation5 + $0x490] sm:$0xff]  ;;  %v416_v20 = vld [vmem:[#allocation5 + $0x760] sm:$0xff]  ;;  %v257_v21 = vld [vmem:[#allocation5 + $0x268] sm:$0xff] }
  0x5f   : > { %570 = vmatpush.msrb.mxu2 %v239_v29  ;;  %530 = vmatpush.msrb.mxu0 %v238_v39  ;;  %v190_v5 = vld [vmem:[#allocation5 + $0x50] sm:$0xff]  ;;  %v385_v22 = vld [vmem:[#allocation5 + $0x668] sm:$0xff]  ;;  %v280_v23 = vld [vmem:[#allocation5 + $0x320] sm:$0xff] }
  0x60   : > { %590 = vmatpush.msrb.mxu3 %v367_v30  ;;  %550 = vmatpush.msrb.mxu1 %v366_v40  ;;  %v318_v6 = vld [vmem:[#allocation5 + $0x450] sm:$0xff]  ;;  %v408_v24 = vld [vmem:[#allocation5 + $0x720] sm:$0xff]  ;;  %v249_v25 = vld [vmem:[#allocation5 + $0x228] sm:$0xff] }
  0x61   : > { %571 = vmatpush.msrb.mxu2 %v231_v33  ;;  %531 = vmatpush.msrb.mxu0 %v230_v43  ;;  %v182_v9 = vld [vmem:[#allocation5 + $0x10] sm:$0xff]  ;;  %v377_v26 = vld [vmem:[#allocation5 + $0x628] sm:$0xff]  ;;  %v272_v27 = vld [vmem:[#allocation5 + $0x2e0] sm:$0xff] }
  0x62   : > { %591 = vmatpush.msrb.mxu3 %v359_v34  ;;  %551 = vmatpush.msrb.mxu1 %v358_v44  ;;  %v310_v10 = vld [vmem:[#allocation5 + $0x410] sm:$0xff]  ;;  %v400_v28 = vld [vmem:[#allocation5 + $0x6e0] sm:$0xff]  ;;  %v241_v29 = vld [vmem:[#allocation5 + $0x1e8] sm:$0xff] }
  0x63   : > { %572 = vmatpush.msrb.mxu2 %v223_v37  ;;  %532 = vmatpush.msrb.mxu0 %v222_v47  ;;  %v369_v30 = vld [vmem:[#allocation5 + $0x5e8] sm:$0xff]  ;;  %v264_v31 = vld [vmem:[#allocation5 + $0x2a0] sm:$0xff] }
  0x64   : > { %592 = vmatpush.msrb.mxu3 %v351_v38  ;;  %552 = vmatpush.msrb.mxu1 %v350_v48  ;;  %v392_v32 = vld [vmem:[#allocation5 + $0x6a0] sm:$0xff]  ;;  %v233_v33 = vld [vmem:[#allocation5 + $0x1a8] sm:$0xff] }
  0x65   : > { %573 = vmatpush.msrb.mxu2 %v215_v41  ;;  %533 = vmatpush.msrb.mxu0 %v214_v51  ;;  %v361_v34 = vld [vmem:[#allocation5 + $0x5a8] sm:$0xff]  ;;  %v256_v35 = vld [vmem:[#allocation5 + $0x260] sm:$0xff] }
  0x66   : > { %593 = vmatpush.msrb.mxu3 %v343_v42  ;;  %553 = vmatpush.msrb.mxu1 %v342_v52  ;;  %v384_v36 = vld [vmem:[#allocation5 + $0x660] sm:$0xff]  ;;  %v225_v37 = vld [vmem:[#allocation5 + $0x168] sm:$0xff] }
  0x67   : > { %574 = vmatpush.msrb.mxu2 %v207_v45  ;;  %518 = vmatmul.f32.vlgmr.msra.gmra.mxu3 %v1219_v56  ;;  %v353_v38 = vld [vmem:[#allocation5 + $0x568] sm:$0xff]  ;;  %v248_v39 = vld [vmem:[#allocation5 + $0x220] sm:$0xff] }
  0x68   : > { %594 = vmatpush.msrb.mxu3 %v335_v46  ;;  %498 = vmatmul.f32.vlgmr.msra.gmra.mxu2 %v1217_v55  ;;  %v376_v40 = vld [vmem:[#allocation5 + $0x620] sm:$0xff]  ;;  %v217_v41 = vld [vmem:[#allocation5 + $0x128] sm:$0xff] }
  0x69   : > { %575 = vmatpush.msrb.mxu2 %v199_v49  ;;  %534 = vmatpush.msrb.mxu0 %v206_v61  ;;  %v345_v42 = vld [vmem:[#allocation5 + $0x528] sm:$0xff]  ;;  %v240_v43 = vld [vmem:[#allocation5 + $0x1e0] sm:$0xff]  ;;  %v307_v61 = vld [vmem:[#allocation5 + $0x3f8] sm:$0xff] }
  0x6a   : > { %595 = vmatpush.msrb.mxu3 %v327_v50  ;;  %554 = vmatpush.msrb.mxu1 %v334_v62  ;;  %v368_v44 = vld [vmem:[#allocation5 + $0x5e0] sm:$0xff]  ;;  %v209_v45 = vld [vmem:[#allocation5 + $0xe8] sm:$0xff]  ;;  %v435_v62 = vld [vmem:[#allocation5 + $0x7f8] sm:$0xff] }
  0x6b   : > { %576 = vmatpush.msrb.mxu2 %v191_v53  ;;  %535 = vmatpush.msrb.mxu0 %v198_v1  ;;  %v337_v46 = vld [vmem:[#allocation5 + $0x4e8] sm:$0xff]  ;;  %v232_v47 = vld [vmem:[#allocation5 + $0x1a0] sm:$0xff]  ;;  %v299_v1 = vld [vmem:[#allocation5 + $0x3b8] sm:$0xff] }
  0x6c   : > { %596 = vmatpush.msrb.mxu3 %v319_v54  ;;  %555 = vmatpush.msrb.mxu1 %v326_v2  ;;  %v360_v48 = vld [vmem:[#allocation5 + $0x5a0] sm:$0xff]  ;;  %v201_v49 = vld [vmem:[#allocation5 + $0xa8] sm:$0xff]  ;;  %v427_v2 = vld [vmem:[#allocation5 + $0x7b8] sm:$0xff] }
  0x6d   : > { %577 = vmatpush.msrb.mxu2 %v183_v57  ;;  %536 = vmatpush.msrb.mxu0 %v190_v5  ;;  %v329_v50 = vld [vmem:[#allocation5 + $0x4a8] sm:$0xff]  ;;  %v224_v51 = vld [vmem:[#allocation5 + $0x160] sm:$0xff]  ;;  %v291_v5 = vld [vmem:[#allocation5 + $0x378] sm:$0xff] }
  0x6e   : > { %597 = vmatpush.msrb.mxu3 %v311_v58  ;;  %556 = vmatpush.msrb.mxu1 %v318_v6  ;;  %v352_v52 = vld [vmem:[#allocation5 + $0x560] sm:$0xff]  ;;  %v193_v53 = vld [vmem:[#allocation5 + $0x68] sm:$0xff]  ;;  %v419_v6 = vld [vmem:[#allocation5 + $0x778] sm:$0xff] }
  0x6f   : > { %642 = vmatpush.msra.mxu2 %v305_v59  ;;  %537 = vmatpush.msrb.mxu0 %v182_v9  ;;  %v321_v54 = vld [vmem:[#allocation5 + $0x468] sm:$0xff]  ;;  %v216_v57 = vld [vmem:[#allocation5 + $0x120] sm:$0xff]  ;;  %v283_v9 = vld [vmem:[#allocation5 + $0x338] sm:$0xff] }
  0x70   : > { %662 = vmatpush.msra.mxu3 %v433_v60  ;;  %557 = vmatpush.msrb.mxu1 %v310_v10  ;;  %v344_v58 = vld [vmem:[#allocation5 + $0x520] sm:$0xff]  ;;  %v185_v59 = vld [vmem:[#allocation5 + $0x28] sm:$0xff]  ;;  %v411_v10 = vld [vmem:[#allocation5 + $0x738] sm:$0xff] }
  0x71   : > { %643 = vmatpush.msra.mxu2 %v297_v63  ;;  %458 = vmatmul.f32.vlgmr.msra.gmra.mxu0 %v1217_v55  ;;  %v313_v60 = vld [vmem:[#allocation5 + $0x428] sm:$0xff]  ;;  %v208_v63 = vld [vmem:[#allocation5 + $0xe0] sm:$0xff] }
  0x72   : > { %663 = vmatpush.msra.mxu3 %v425_v0  ;;  %478 = vmatmul.f32.vlgmr.msra.gmra.mxu1 %v1219_v56  ;;  %v336_v0 = vld [vmem:[#allocation5 + $0x4e0] sm:$0xff] }
  0x73   : > { %644 = vmatpush.msra.mxu2 %v289_v3  ;;  %602 = vmatpush.msra.mxu0 %v304_v11  ;;  %v200_v3 = vld [vmem:[#allocation5 + $0xa0] sm:$0xff] }
  0x74   : > { %664 = vmatpush.msra.mxu3 %v417_v4  ;;  %622 = vmatpush.msra.mxu1 %v432_v12  ;;  %v328_v4 = vld [vmem:[#allocation5 + $0x4a0] sm:$0xff] }
  0x75   : > { %645 = vmatpush.msra.mxu2 %v281_v7  ;;  %603 = vmatpush.msra.mxu0 %v296_v15  ;;  %v192_v7 = vld [vmem:[#allocation5 + $0x60] sm:$0xff]  ;;  %v275_v15 = vld [vmem:[#allocation5 + $0x2f8] sm:$0xff] }
  0x76   : > { %665 = vmatpush.msra.mxu3 %v409_v8  ;;  %623 = vmatpush.msra.mxu1 %v424_v16  ;;  %v320_v8 = vld [vmem:[#allocation5 + $0x460] sm:$0xff]  ;;  %v403_v16 = vld [vmem:[#allocation5 + $0x6f8] sm:$0xff] }
  0x77   : > { %646 = vmatpush.msra.mxu2 %v273_v13  ;;  %604 = vmatpush.msra.mxu0 %v288_v19  ;;  %v184_v11 = vld [vmem:[#allocation5 + $0x20] sm:$0xff]  ;;  %v306_v13 = vld [vmem:[#allocation5 + $0x3f0] sm:$0xff]  ;;  %v267_v19 = vld [vmem:[#allocation5 + $0x2b8] sm:$0xff] }
  0x78   : > { %666 = vmatpush.msra.mxu3 %v401_v14  ;;  %624 = vmatpush.msra.mxu1 %v416_v20  ;;  %v312_v12 = vld [vmem:[#allocation5 + $0x420] sm:$0xff]  ;;  %v434_v14 = vld [vmem:[#allocation5 + $0x7f0] sm:$0xff]  ;;  %v395_v20 = vld [vmem:[#allocation5 + $0x6b8] sm:$0xff] }
  0x79   : > { %647 = vmatpush.msra.mxu2 %v265_v17  ;;  %605 = vmatpush.msra.mxu0 %v280_v23  ;;  %v298_v17 = vld [vmem:[#allocation5 + $0x3b0] sm:$0xff]  ;;  %v259_v23 = vld [vmem:[#allocation5 + $0x278] sm:$0xff] }
  0x7a   : > { %667 = vmatpush.msra.mxu3 %v393_v18  ;;  %625 = vmatpush.msra.mxu1 %v408_v24  ;;  %v426_v18 = vld [vmem:[#allocation5 + $0x7b0] sm:$0xff]  ;;  %v387_v24 = vld [vmem:[#allocation5 + $0x678] sm:$0xff] }
  0x7b   : > { %648 = vmatpush.msra.mxu2 %v257_v21  ;;  %606 = vmatpush.msra.mxu0 %v272_v27  ;;  %v290_v21 = vld [vmem:[#allocation5 + $0x370] sm:$0xff]  ;;  %v251_v27 = vld [vmem:[#allocation5 + $0x238] sm:$0xff] }
  0x7c   : > { %668 = vmatpush.msra.mxu3 %v385_v22  ;;  %626 = vmatpush.msra.mxu1 %v400_v28  ;;  %v418_v22 = vld [vmem:[#allocation5 + $0x770] sm:$0xff]  ;;  %v379_v28 = vld [vmem:[#allocation5 + $0x638] sm:$0xff] }
  0x7d   : > { %649 = vmatpush.msra.mxu2 %v249_v25  ;;  %607 = vmatpush.msra.mxu0 %v264_v31  ;;  %v282_v25 = vld [vmem:[#allocation5 + $0x330] sm:$0xff]  ;;  %v243_v31 = vld [vmem:[#allocation5 + $0x1f8] sm:$0xff] }
  0x7e   : > { %669 = vmatpush.msra.mxu3 %v377_v26  ;;  %627 = vmatpush.msra.mxu1 %v392_v32  ;;  %v410_v26 = vld [vmem:[#allocation5 + $0x730] sm:$0xff]  ;;  %v371_v32 = vld [vmem:[#allocation5 + $0x5f8] sm:$0xff] }
  0x7f   : > { %650 = vmatpush.msra.mxu2 %v241_v29  ;;  %608 = vmatpush.msra.mxu0 %v256_v35  ;;  %v274_v29 = vld [vmem:[#allocation5 + $0x2f0] sm:$0xff]  ;;  %v235_v35 = vld [vmem:[#allocation5 + $0x1b8] sm:$0xff] }
  0x80   : > { %670 = vmatpush.msra.mxu3 %v369_v30  ;;  %628 = vmatpush.msra.mxu1 %v384_v36  ;;  %v402_v30 = vld [vmem:[#allocation5 + $0x6f0] sm:$0xff]  ;;  %v363_v36 = vld [vmem:[#allocation5 + $0x5b8] sm:$0xff] }
  0x81   : > { %651 = vmatpush.msra.mxu2 %v233_v33  ;;  %609 = vmatpush.msra.mxu0 %v248_v39  ;;  %v266_v33 = vld [vmem:[#allocation5 + $0x2b0] sm:$0xff]  ;;  %v227_v39 = vld [vmem:[#allocation5 + $0x178] sm:$0xff] }
  0x82   : > { %671 = vmatpush.msra.mxu3 %v361_v34  ;;  %629 = vmatpush.msra.mxu1 %v376_v40  ;;  %v394_v34 = vld [vmem:[#allocation5 + $0x6b0] sm:$0xff]  ;;  %v355_v40 = vld [vmem:[#allocation5 + $0x578] sm:$0xff] }
  0x83   : > { %652 = vmatpush.msra.mxu2 %v225_v37  ;;  %610 = vmatpush.msra.mxu0 %v240_v43  ;;  %v258_v37 = vld [vmem:[#allocation5 + $0x270] sm:$0xff]  ;;  %v219_v43 = vld [vmem:[#allocation5 + $0x138] sm:$0xff] }
  0x84   : > { %672 = vmatpush.msra.mxu3 %v353_v38  ;;  %630 = vmatpush.msra.mxu1 %v368_v44  ;;  %v386_v38 = vld [vmem:[#allocation5 + $0x670] sm:$0xff]  ;;  %v347_v44 = vld [vmem:[#allocation5 + $0x538] sm:$0xff] }
  0x85   : > { %653 = vmatpush.msra.mxu2 %v217_v41  ;;  %611 = vmatpush.msra.mxu0 %v232_v47  ;;  %v250_v41 = vld [vmem:[#allocation5 + $0x230] sm:$0xff]  ;;  %v211_v47 = vld [vmem:[#allocation5 + $0xf8] sm:$0xff] }
  0x86   : > { %673 = vmatpush.msra.mxu3 %v345_v42  ;;  %631 = vmatpush.msra.mxu1 %v360_v48  ;;  %v378_v42 = vld [vmem:[#allocation5 + $0x630] sm:$0xff]  ;;  %v339_v48 = vld [vmem:[#allocation5 + $0x4f8] sm:$0xff] }
  0x87   : > { %654 = vmatpush.msra.mxu2 %v209_v45  ;;  %612 = vmatpush.msra.mxu0 %v224_v51  ;;  %v242_v45 = vld [vmem:[#allocation5 + $0x1f0] sm:$0xff]  ;;  %v203_v51 = vld [vmem:[#allocation5 + $0xb8] sm:$0xff] }
  0x88   : > { %674 = vmatpush.msra.mxu3 %v337_v46  ;;  %632 = vmatpush.msra.mxu1 %v352_v52  ;;  %v370_v46 = vld [vmem:[#allocation5 + $0x5f0] sm:$0xff]  ;;  %v331_v52 = vld [vmem:[#allocation5 + $0x4b8] sm:$0xff] }
  0x89   : > { %655 = vmatpush.msra.mxu2 %v201_v49  ;;  %613 = vmatpush.msra.mxu0 %v216_v57  ;;  %v234_v49 = vld [vmem:[#allocation5 + $0x1b0] sm:$0xff]  ;;  %v195_v57 = vld [vmem:[#allocation5 + $0x78] sm:$0xff] }
  0x8a   : > { %675 = vmatpush.msra.mxu3 %v329_v50  ;;  %633 = vmatpush.msra.mxu1 %v344_v58  ;;  %v362_v50 = vld [vmem:[#allocation5 + $0x5b0] sm:$0xff]  ;;  %v323_v58 = vld [vmem:[#allocation5 + $0x478] sm:$0xff] }
  0x8b   : > { %656 = vmatpush.msra.mxu2 %v193_v53  ;;  %598 = vmatmul.f32.vlgmr.msrb.gmra.mxu3 %v1219_v56  ;;  %v226_v53 = vld [vmem:[#allocation5 + $0x170] sm:$0xff] }
  0x8c   : > { %676 = vmatpush.msra.mxu3 %v321_v54  ;;  %578 = vmatmul.f32.vlgmr.msrb.gmra.mxu2 %v1217_v55  ;;  %v354_v54 = vld [vmem:[#allocation5 + $0x570] sm:$0xff] }
  0x8d   : > { %657 = vmatpush.msra.mxu2 %v185_v59  ;;  %614 = vmatpush.msra.mxu0 %v208_v63  ;;  %v218_v59 = vld [vmem:[#allocation5 + $0x130] sm:$0xff] }
  0x8e   : > { %677 = vmatpush.msra.mxu3 %v313_v60  ;;  %634 = vmatpush.msra.mxu1 %v336_v0  ;;  %v346_v60 = vld [vmem:[#allocation5 + $0x530] sm:$0xff] }
  0x8f   : > { %722 = vmatpush.msrb.mxu2 %v307_v61  ;;  %615 = vmatpush.msra.mxu0 %v200_v3  ;;  %v187_v61 = vld [vmem:[#allocation5 + $0x38] sm:$0xff]  ;;  %v210_v63 = vld [vmem:[#allocation5 + $0xf0] sm:$0xff] }
  0x90   : > { %742 = vmatpush.msrb.mxu3 %v435_v62  ;;  %635 = vmatpush.msra.mxu1 %v328_v4  ;;  %v315_v62 = vld [vmem:[#allocation5 + $0x438] sm:$0xff]  ;;  %v338_v0 = vld [vmem:[#allocation5 + $0x4f0] sm:$0xff] }
  0x91   : > { %723 = vmatpush.msrb.mxu2 %v299_v1  ;;  %616 = vmatpush.msra.mxu0 %v192_v7  ;;  %v202_v1 = vld [vmem:[#allocation5 + $0xb0] sm:$0xff] }
  0x92   : > { %743 = vmatpush.msrb.mxu3 %v427_v2  ;;  %636 = vmatpush.msra.mxu1 %v320_v8  ;;  %v330_v2 = vld [vmem:[#allocation5 + $0x4b0] sm:$0xff] }
  0x93   : > { %724 = vmatpush.msrb.mxu2 %v291_v5  ;;  %617 = vmatpush.msra.mxu0 %v184_v11  ;;  %v194_v3 = vld [vmem:[#allocation5 + $0x70] sm:$0xff] }
  0x94   : > { %744 = vmatpush.msrb.mxu3 %v419_v6  ;;  %637 = vmatpush.msra.mxu1 %v312_v12  ;;  %v322_v4 = vld [vmem:[#allocation5 + $0x470] sm:$0xff] }
  0x95   : > { %725 = vmatpush.msrb.mxu2 %v283_v9  ;;  %538 = vmatmul.f32.vlgmr.msrb.gmra.mxu0 %v1217_v55  ;;  %v186_v5 = vld [vmem:[#allocation5 + $0x30] sm:$0xff] }
  0x96   : > { %745 = vmatpush.msrb.mxu3 %v411_v10  ;;  %558 = vmatmul.f32.vlgmr.msrb.gmra.mxu1 %v1219_v56  ;;  %v314_v6 = vld [vmem:[#allocation5 + $0x430] sm:$0xff] }
  0x97   : > { %682 = vmatpush.msrb.mxu0 %v306_v13  ;;  %702 = vmatpush.msrb.mxu1 %v434_v14 }
  0x98   : > { %726 = vmatpush.msrb.mxu2 %v275_v15  ;;  %746 = vmatpush.msrb.mxu3 %v403_v16 }
  0x99   : > { %683 = vmatpush.msrb.mxu0 %v298_v17  ;;  %703 = vmatpush.msrb.mxu1 %v426_v18 }
  0x9a   : > { %727 = vmatpush.msrb.mxu2 %v267_v19  ;;  %747 = vmatpush.msrb.mxu3 %v395_v20 }
  0x9b   : > { %684 = vmatpush.msrb.mxu0 %v290_v21  ;;  %704 = vmatpush.msrb.mxu1 %v418_v22 }
  0x9c   : > { %728 = vmatpush.msrb.mxu2 %v259_v23  ;;  %748 = vmatpush.msrb.mxu3 %v387_v24 }
  0x9d   : > { %685 = vmatpush.msrb.mxu0 %v282_v25  ;;  %705 = vmatpush.msrb.mxu1 %v410_v26 }
  0x9e   : > { %729 = vmatpush.msrb.mxu2 %v251_v27  ;;  %749 = vmatpush.msrb.mxu3 %v379_v28 }
  0x9f   : > { %686 = vmatpush.msrb.mxu0 %v274_v29  ;;  %706 = vmatpush.msrb.mxu1 %v402_v30 }
  0xa0   : > { %730 = vmatpush.msrb.mxu2 %v243_v31  ;;  %750 = vmatpush.msrb.mxu3 %v371_v32 }
  0xa1   : > { %687 = vmatpush.msrb.mxu0 %v266_v33  ;;  %707 = vmatpush.msrb.mxu1 %v394_v34 }
  0xa2   : > { %731 = vmatpush.msrb.mxu2 %v235_v35  ;;  %751 = vmatpush.msrb.mxu3 %v363_v36 }
  0xa3   : > { %688 = vmatpush.msrb.mxu0 %v258_v37  ;;  %708 = vmatpush.msrb.mxu1 %v386_v38 }
  0xa4   : > { %732 = vmatpush.msrb.mxu2 %v227_v39  ;;  %752 = vmatpush.msrb.mxu3 %v355_v40 }
  0xa5   : > { %689 = vmatpush.msrb.mxu0 %v250_v41  ;;  %709 = vmatpush.msrb.mxu1 %v378_v42 }
  0xa6   : > { %733 = vmatpush.msrb.mxu2 %v219_v43  ;;  %753 = vmatpush.msrb.mxu3 %v347_v44 }
  0xa7   : > { %658 = vmatmul.f32.vlgmr.msra.gmra.mxu2 %v1217_v55  ;;  %678 = vmatmul.f32.vlgmr.msra.gmra.mxu3 %v1219_v56 }
  0xa8   : > { %690 = vmatpush.msrb.mxu0 %v242_v45  ;;  %710 = vmatpush.msrb.mxu1 %v370_v46 }
  0xa9   : > { %734 = vmatpush.msrb.mxu2 %v211_v47  ;;  %754 = vmatpush.msrb.mxu3 %v339_v48 }
  0xaa   : > { %691 = vmatpush.msrb.mxu0 %v234_v49  ;;  %711 = vmatpush.msrb.mxu1 %v362_v50 }
  0xab   : > { %735 = vmatpush.msrb.mxu2 %v203_v51  ;;  %755 = vmatpush.msrb.mxu3 %v331_v52 }
  0xac   : > { %692 = vmatpush.msrb.mxu0 %v226_v53  ;;  %712 = vmatpush.msrb.mxu1 %v354_v54 }
  0xad   : > { %736 = vmatpush.msrb.mxu2 %v195_v57  ;;  %756 = vmatpush.msrb.mxu3 %v323_v58 }
  0xae   : > { %693 = vmatpush.msrb.mxu0 %v218_v59  ;;  %713 = vmatpush.msrb.mxu1 %v346_v60 }
  0xaf   : > { %737 = vmatpush.msrb.mxu2 %v187_v61  ;;  %757 = vmatpush.msrb.mxu3 %v315_v62 }
  0xb0   : > { %618 = vmatmul.f32.vlgmr.msra.gmra.mxu0 %v1217_v55  ;;  %638 = vmatmul.f32.vlgmr.msra.gmra.mxu1 %v1219_v56 }
  0xb1   : > { %738 = vmatmul.f32.vlgmr.msrb.gmra.mxu2 %v1217_v55  ;;  %758 = vmatmul.f32.vlgmr.msrb.gmra.mxu3 %v1219_v56 }
  0xb2   : > { %694 = vmatpush.msrb.mxu0 %v210_v63  ;;  %714 = vmatpush.msrb.mxu1 %v338_v0 }
  0xb4   : > { %695 = vmatpush.msrb.mxu0 %v202_v1  ;;  %715 = vmatpush.msrb.mxu1 %v330_v2 }
  0xb6   : > { %696 = vmatpush.msrb.mxu0 %v194_v3  ;;  %716 = vmatpush.msrb.mxu1 %v322_v4 }
  0xb8   : > { %697 = vmatpush.msrb.mxu0 %v186_v5  ;;  %717 = vmatpush.msrb.mxu1 %v314_v6 }
  0xb9   : > { %698 = vmatmul.f32.vlgmr.msrb.gmra.mxu0 %v1217_v55  ;;  %718 = vmatmul.f32.vlgmr.msrb.gmra.mxu1 %v1219_v56 }
  0xea   : > { %v519_v8 = vpop.f32.mrf.mxu3 }
  0xeb   : > { %v499_v7 = vpop.f32.mrf.mxu2 }
  0xec   : > { %v520_v9 = vadd.f32 %v519_v8, %v499_v7 }
  0xee   : > { %v770_v10 = vrot.slane %v520_v9, 4  ;;  %v459_v11 = vpop.f32.mrf.mxu0 }
  0xef   : > { %v479_v12 = vpop.f32.mrf.mxu1 }
  0xf0   : > { %v480_v13 = vadd.f32 %v479_v12, %v459_v11 }
  0xf2   : > { %v775_v14 = vsel %vm774_vm0, %v480_v13, %v770_v10 }
  0xf3   : > { %783 = vst [vmem:[%s1239_s27] sm:$0xff] %v775_v14 }
 0x10e   : > { %v599_v55 = vpop.f32.mrf.mxu3 }
 0x10f   : > { %v579_v15 = vpop.f32.mrf.mxu2 }
 0x110   : > { %v600_v56 = vadd.f32 %v599_v55, %v579_v15 }
 0x112   : > { %v771_v16 = vrot.slane %v600_v56, 4  ;;  %v539_v17 = vpop.f32.mrf.mxu0 }
 0x113   : > { %v559_v18 = vpop.f32.mrf.mxu1 }
 0x114   : > { %v560_v19 = vadd.f32 %v559_v18, %v539_v17 }
 0x116   : > { %v776_v20 = vsel %vm774_vm0, %v560_v19, %v771_v16 }
 0x117   : > { %784 = vst [vmem:[%s1239_s27 + $0x8] sm:$0xff] %v776_v20 }
 0x12a   : > { %v659_v21 = vpop.f32.mrf.mxu2  ;;  %v679_v22 = vpop.f32.mrf.mxu3 }
 0x12b   : > { %v680_v23 = vadd.f32 %v679_v22, %v659_v21 }
 0x12d   : > { %v772_v24 = vrot.slane %v680_v23, 4  ;;  %v619_v25 = vpop.f32.mrf.mxu0  ;;  %v639_v26 = vpop.f32.mrf.mxu1 }
 0x12e   : > { %v640_v27 = vadd.f32 %v639_v26, %v619_v25 }
 0x130   : > { %v777_v28 = vsel %vm774_vm0, %v640_v27, %v772_v24 }
 0x131   : > { %785 = vst [vmem:[%s1239_s27 + $0x10] sm:$0xff] %v777_v28 }
 0x134   : > { %v739_v29 = vpop.f32.mrf.mxu2  ;;  %v759_v30 = vpop.f32.mrf.mxu3 }
 0x135   : > { %v760_v31 = vadd.f32 %v759_v30, %v739_v29 }
 0x136   : > { %v699_v32 = vpop.f32.mrf.mxu0  ;;  %v719_v33 = vpop.f32.mrf.mxu1 }
 0x137   : > { %v773_v34 = vrot.slane %v760_v31, 4  ;;  %v720_v35 = vadd.f32 %v719_v33, %v699_v32 }
 0x139   : > { %v778_v36 = vsel %vm774_vm0, %v720_v35, %v773_v34 }
 0x13a   : > { %786 = vst [vmem:[%s1239_s27 + $0x18] sm:$0xff] %v778_v36 }
 0x13b   : > { %1048 = shalt.err (!%p1045_p9)
}
 0x13c   : > { %908 = dma.vmem_to_hbm [thread:$0]  (%p1171_p13), %s802_s15, 512, %s804_s18, %s788_s16  }
 0x13d PF: > { %s815_s29 = sand.u32 1, %s1079_s9   ;;  %p1290_p10 = scmp.ge.s32.totalorder %s1091_s12, 2 }
 0x13e   : > { %s816_s4 = scalar_lea.sflag [#allocation4], %s815_s29 }
 0x13f   : > { %p919_p11 = pnand %p1290_p10, %p1176_p4 }
 0x141   : > { %p920_p0 = pneg %p919_p11 }
 0x143   : > { %1074 = dma.done.wait (%p920_p0), %s816_s4, 512  }
 0x144   : > { %1076 = vsyncadd (%p920_p0), %s816_s4, 4294966784  ;;  %p16_p2 = scmp.ge.s32.totalorder %s1151_s23, 4   ;;  %s1291_s9 = smov %s1083_s10 }
 0x145   : > { %s1292_s10 = smov %s1087_s11  ;;  %s1293_s11 = smov %s1163_s26 }
 0x146   : > { %s1294_s12 = smov %s1151_s23  ;;  %18 = sbr.rel (!%p16_p2) target bundleno = 6 (0x6), region = 77 }
 0x14b   :  { %822 = vsyncpa [#allocation3], 1 }
 0x14c   :  { %824 = vsyncpa [#allocation3 + $0x1], 1 }
 0x14d   :  { %825 = vsyncpa [#allocation6], 1 }
 0x14e   :  { %826 = vsyncpa [#allocation4], 1 }
 0x14f   :  { %828 = vsyncpa [#allocation4 + $0x1], 1 }

</bundles_post_ra>
